<compile_context>
chip_gen: v5e
topology: v5e:2x2
jax: 0.10.0
libtpu: 0.0.40
codegen_flags: <defaults>
</compile_context>

<pallas_src>
import functools

import jax
import jax.numpy as jnp
from jax import lax
from jax.experimental import pallas as pl
from jax.experimental.pallas import tpu as pltpu


def _uniform_noise(rows, cols, seed_u32):
    """Deterministic per-element uniform [0, 0.01) noise from an integer hash.

    Pure jnp integer ops (no pltpu.prng_*), so it lowers both on Mosaic TPU
    and on the CPU/interpret path used for correctness checks.
    """
    h = (rows.astype(jnp.uint32) * jnp.uint32(0x9E3779B1)
         + cols.astype(jnp.uint32) * jnp.uint32(0x85EBCA77)
         + seed_u32)
    h = h ^ (h >> 16)
    h = h * jnp.uint32(0x7FEB352D)
    h = h ^ (h >> 15)
    h = h * jnp.uint32(0x846CA68B)
    h = h ^ (h >> 16)
    mant = (h & jnp.uint32(0x7FFFFF)).astype(jnp.int32)
    return mant.astype(jnp.float32) * jnp.float32(0.01 / (1 << 23))


def _embedding_graph_kernel(seed_ref, a_ref, b_ref, out_ref, *,
                            alpha, top_k, n_valid, tile_m, neg_slope=0.01):
    row0 = pl.program_id(0) * tile_m

    # Single fused NT matmul: matrix = [vec1,-vec2] @ [vec2,vec1]^T (K = 2D),
    # bf16 operands, f32 accumulation on the MXU.
    dn = (((1,), (1,)), ((), ()))
    m = lax.dot_general(a_ref[...], b_ref[...], dn,
                        preferred_element_type=jnp.float32)       # (TM, NP) f32

    # adj = LeakyReLU(tanh(alpha * matrix)); torch default negative_slope = 0.01.
    t = jnp.tanh(jnp.float32(alpha) * m)
    adj = jnp.where(t > 0, t, jnp.float32(neg_slope) * t)

    # Noisy scores for top-k ranking: adj + U[0, 0.01); padded cols never win.
    rows = lax.broadcasted_iota(jnp.int32, adj.shape, 0) + row0
    cols = lax.broadcasted_iota(jnp.int32, adj.shape, 1)
    noise = _uniform_noise(rows, cols, seed_ref[0].astype(jnp.uint32))
    neg_inf = jnp.float32(-1e30)
    scores0 = jnp.where(cols < n_valid, adj + noise, neg_inf)

    # Threshold-form row-wise top-k: per iteration one cross-lane row max (XLU)
    # and one `where` on scores (VPU). After top_k iterations `thresh` holds the
    # k-th largest score per row; a single final pass builds the masked output.
    def body(_, carry):
        scores, _thr = carry
        row_max = jnp.max(scores, axis=1, keepdims=True)
        return jnp.where(scores >= row_max, neg_inf, scores), row_max

    init = (scores0, jnp.zeros((tile_m, 1), jnp.float32))
    if top_k <= 8:
        _, thresh = lax.fori_loop(0, top_k, body, init, unroll=True)
    else:
        _, thresh = lax.fori_loop(0, top_k, body, init, unroll=4)

    out_ref[...] = jnp.where(scores0 >= thresh, adj, jnp.float32(0.0))


def _round_up(x, m):
    return (x + m - 1) // m * m


def _vmem_footprint(tm, n_cols, d2):
    return (2 * n_cols * d2 * 2      # resident RHS (bf16), double-buffered
            + 2 * tm * d2 * 2        # LHS row tile (bf16), double-buffered
            + 2 * tm * n_cols * 4    # output tile (f32), double-buffered
            + 6 * tm * n_cols * 4)   # live (TM, NP) f32 temporaries in the body


def embedding_graph(index_input, emb1, emb2, *, alpha, top_k, seed=0):
    """Forward pass of EmbeddingGraph. Returns the masked (N, N) adjacency (f32)."""
    # Embedding lookup (pure row gather) kept as plain JAX glue.
    # TODO(synk): fold the gather + padding into the kernel (scalar prefetch +
    # pl.Element row gather) if N*D ever becomes large enough to matter.
    vec1 = emb1[index_input].astype(jnp.float32)      # (N, D)
    vec2 = emb2[index_input].astype(jnp.float32)      # (N, D)
    n, d = vec1.shape
    assert 1 <= top_k <= n, "top_k must be in [1, N]"

    # Fuse vec1@vec2^T - vec2@vec1^T into one matmul A @ B^T with
    # A = [vec1, -vec2], B = [vec2, vec1]  (contraction depth 2D).
    a = jnp.concatenate([vec1, -vec2], axis=1)
    b = jnp.concatenate([vec2, vec1], axis=1)
    d2 = 2 * d

    n_cols = max(_round_up(n, 128), 128)              # lane-dense output columns

    # Generation-aware VMEM budget with explicit headroom (v7x has 64 MiB/TC).
    try:
        info = pltpu.get_tpu_info()
        vmem_cap = int(getattr(info, "vmem_capacity_bytes", 64 * 1024 * 1024))
    except Exception:
        vmem_cap = 64 * 1024 * 1024
    budget = int(vmem_cap * 0.70)

    # Largest power-of-two row tile (>= 8) fitting the budget, capped at half
    # the rows so the grid has >= 2 steps (keeps both v7x TensorCores busy).
    n_rows8 = _round_up(n, 8)
    cap = max(8, n_rows8 // 2)
    tile_m = 8
    for cand in (1024, 512, 256, 128, 64, 32, 16, 8):
        if cand > cap:
            continue
        if _vmem_footprint(cand, n_cols, d2) <= budget:
            tile_m = cand
            break
    n_rows = _round_up(n, tile_m)                     # rows padded only to tile size
    foot = _vmem_footprint(tile_m, n_cols, d2)
    vmem_limit = int(min(max(1.5 * foot, 32 * 1024 * 1024), 0.9 * vmem_cap))

    a_p = jnp.pad(a, ((0, n_rows - n), (0, 0))).astype(jnp.bfloat16)
    b_p = jnp.pad(b, ((0, n_cols - n), (0, 0))).astype(jnp.bfloat16)
    seed_arr = jnp.asarray([seed], dtype=jnp.int32)

    kernel = functools.partial(
        _embedding_graph_kernel,
        alpha=float(alpha), top_k=int(top_k), n_valid=int(n), tile_m=int(tile_m))

    adj_pad = pl.pallas_call(
        kernel,
        out_shape=jax.ShapeDtypeStruct((n_rows, n_cols), jnp.float32),
        grid=(n_rows // tile_m,),
        in_specs=[
            pl.BlockSpec(memory_space=pltpu.MemorySpace.SMEM),   # seed scalar
            pl.BlockSpec((tile_m, d2), lambda i: (i, 0)),        # A row tile (pipelined)
            pl.BlockSpec((n_cols, d2), lambda i: (0, 0)),        # B resident
        ],
        out_specs=pl.BlockSpec((tile_m, n_cols), lambda i: (i, 0)),
        compiler_params=pltpu.CompilerParams(
            dimension_semantics=("parallel",),
            vmem_limit_bytes=vmem_limit),
    )(seed_arr, a_p, b_p)

    if n_rows == n and n_cols == n:
        return adj_pad                                # no padding -> no copy
    return adj_pad[:n, :n]


if __name__ == "__main__":
    # Small, deterministic setup consistent with the module's __init__.
    nodes, dim = 16, 32        # nn.Embedding(nodes, dim) x2
    n_idx = 8                  # index_input.size(0)
    top_k = 3
    alpha = 3.0
    seed = 0

    key = jax.random.PRNGKey(0)
    k1, k2, k3 = jax.random.split(key, 3)

    # nn.Embedding default init: N(0, 1)
    emb1 = jax.random.normal(k1, (nodes, dim), dtype=jnp.float32)
    emb2 = jax.random.normal(k2, (nodes, dim), dtype=jnp.float32)

    # Deterministic distinct node indices.
    index_input = jax.random.permutation(k3, jnp.arange(nodes, dtype=jnp.int32))[:n_idx]

    adj = embedding_graph(index_input, emb1, emb2, alpha=alpha, top_k=top_k, seed=seed)
    adj = jax.block_until_ready(adj)

    assert adj.shape == (n_idx, n_idx) and adj.dtype == jnp.float32

    # Structural check: each row keeps at most top_k nonzero entries
    # (selected entries may themselves be ~0, e.g. the anti-symmetric diagonal).
    nnz_per_row = (adj != 0).sum(axis=1)
    assert int(nnz_per_row.max()) <= top_k

    # Value check: every kept entry matches the (bf16-matmul) reference adjacency.
    v1 = emb1[index_input].astype(jnp.float32)
    v2 = emb2[index_input].astype(jnp.float32)
    a_ref = jnp.concatenate([v1, -v2], axis=1).astype(jnp.bfloat16)
    b_ref = jnp.concatenate([v2, v1], axis=1).astype(jnp.bfloat16)
    m_ref = jnp.dot(a_ref, b_ref.T, preferred_element_type=jnp.float32)
    t_ref = jnp.tanh(alpha * m_ref)
    adj_ref = jnp.where(t_ref > 0, t_ref, 0.01 * t_ref)
    kept = adj != 0
    max_err = float(jnp.max(jnp.where(kept, jnp.abs(adj - adj_ref), 0.0)))
    assert max_err < 5e-3, max_err

    print("KERNEL_OK")
</pallas_src>

<mosaic_0001>
module attributes {stable_mosaic.version = 11 : i64} {
  func.func @_embedding_graph_kernel(%arg0: i32, %arg1: memref<1xi32, #tpu.memory_space<smem>>, %arg2: memref<8x64xbf16, #tpu.memory_space<vmem>>, %arg3: memref<128x64xbf16, #tpu.memory_space<vmem>>, %arg4: memref<8x128xf32, #tpu.memory_space<vmem>>) attributes {dimension_semantics = [#tpu.dimension_semantics<parallel>], iteration_bounds = array<i64: 1>, scalar_prefetch = 0 : i64, scratch_operands = 0 : i64, tpu.core_type = #tpu.core_type<tc>, window_params = [{transform_indices = @transform_0, window_bounds = array<i64: 1>}, {transform_indices = @transform_1, window_bounds = array<i64: 8, 64>}, {pipeline_mode = #tpu.pipeline_mode<synchronous>, transform_indices = @transform_2, window_bounds = array<i64: 128, 64>}, {transform_indices = @transform_3, window_bounds = array<i64: 8, 128>}]} {
    %c8_i32 = arith.constant 8 : i32
    %0 = arith.muli %arg0, %c8_i32 : i32
    %c0 = arith.constant 0 : index
    %c0_0 = arith.constant 0 : index
    %1 = vector.load %arg2[%c0, %c0_0] : memref<8x64xbf16, #tpu.memory_space<vmem>>, vector<8x64xbf16>
    %c0_1 = arith.constant 0 : index
    %c0_2 = arith.constant 0 : index
    %2 = vector.load %arg3[%c0_1, %c0_2] : memref<128x64xbf16, #tpu.memory_space<vmem>>, vector<128x64xbf16>
    %cst = arith.constant dense<0.000000e+00> : vector<8x128xf32>
    %3 = tpu.matmul %1, %2, %cst {dimension_numbers = #tpu.dot_dimension_numbers<[1], [1], [0], [0], [0, 0, 1, 0], [], []>} : vector<8x64xbf16>, vector<128x64xbf16>, vector<8x128xf32> -> vector<8x128xf32>
    %cst_3 = arith.constant 3.000000e+00 : f32
    %4 = vector.broadcast %cst_3 : f32 to vector<8x128xf32>
    %5 = arith.mulf %4, %3 : vector<8x128xf32>
    %6 = math.tanh %5 : vector<8x128xf32>
    %cst_4 = arith.constant 0.000000e+00 : f32
    %7 = vector.broadcast %cst_4 : f32 to vector<8x128xf32>
    %8 = arith.cmpf ogt, %6, %7 : vector<8x128xf32>
    %cst_5 = arith.constant 0.00999999977 : f32
    %9 = vector.broadcast %cst_5 : f32 to vector<8x128xf32>
    %10 = arith.mulf %9, %6 : vector<8x128xf32>
    %11 = arith.select %8, %6, %10 : vector<8x128xi1>, vector<8x128xf32>
    %12 = tpu.iota {dimensions = array<i32: 0>} : vector<8x128xi32>
    %13 = vector.broadcast %0 : i32 to vector<8x128xi32>
    %14 = arith.addi %12, %13 : vector<8x128xi32>
    %15 = tpu.iota {dimensions = array<i32: 1>} : vector<8x128xi32>
    %c0_6 = arith.constant 0 : index
    %16 = memref.load %arg1[%c0_6] : memref<1xi32, #tpu.memory_space<smem>>
    %c-1640531535_i32 = arith.constant -1640531535 : i32
    %17 = vector.broadcast %c-1640531535_i32 : i32 to vector<8x128xi32>
    %18 = arith.muli %14, %17 : vector<8x128xi32>
    %c-2048144777_i32 = arith.constant -2048144777 : i32
    %19 = vector.broadcast %c-2048144777_i32 : i32 to vector<8x128xi32>
    %20 = arith.muli %15, %19 : vector<8x128xi32>
    %21 = arith.addi %18, %20 : vector<8x128xi32>
    %22 = vector.broadcast %16 : i32 to vector<8x128xi32>
    %23 = arith.addi %21, %22 : vector<8x128xi32>
    %c16_i32 = arith.constant 16 : i32
    %24 = vector.broadcast %c16_i32 : i32 to vector<8x128xi32>
    %25 = arith.shrui %23, %24 : vector<8x128xi32>
    %26 = arith.xori %23, %25 : vector<8x128xi32>
    %c2146121005_i32 = arith.constant 2146121005 : i32
    %27 = vector.broadcast %c2146121005_i32 : i32 to vector<8x128xi32>
    %28 = arith.muli %26, %27 : vector<8x128xi32>
    %c15_i32 = arith.constant 15 : i32
    %29 = vector.broadcast %c15_i32 : i32 to vector<8x128xi32>
    %30 = arith.shrui %28, %29 : vector<8x128xi32>
    %31 = arith.xori %28, %30 : vector<8x128xi32>
    %c-2073254261_i32 = arith.constant -2073254261 : i32
    %32 = vector.broadcast %c-2073254261_i32 : i32 to vector<8x128xi32>
    %33 = arith.muli %31, %32 : vector<8x128xi32>
    %c16_i32_7 = arith.constant 16 : i32
    %34 = vector.broadcast %c16_i32_7 : i32 to vector<8x128xi32>
    %35 = arith.shrui %33, %34 : vector<8x128xi32>
    %36 = arith.xori %33, %35 : vector<8x128xi32>
    %c8388607_i32 = arith.constant 8388607 : i32
    %37 = vector.broadcast %c8388607_i32 : i32 to vector<8x128xi32>
    %38 = arith.andi %36, %37 : vector<8x128xi32>
    %39 = arith.sitofp %38 : vector<8x128xi32> to vector<8x128xf32>
    %cst_8 = arith.constant 1.19209287E-9 : f32
    %40 = vector.broadcast %cst_8 : f32 to vector<8x128xf32>
    %41 = arith.mulf %39, %40 : vector<8x128xf32>
    %c8_i32_9 = arith.constant 8 : i32
    %42 = vector.broadcast %c8_i32_9 : i32 to vector<8x128xi32>
    %43 = arith.cmpi slt, %15, %42 : vector<8x128xi32>
    %44 = arith.addf %11, %41 : vector<8x128xf32>
    %cst_10 = arith.constant -1.000000e+30 : f32
    %45 = vector.broadcast %cst_10 : f32 to vector<8x128xf32>
    %46 = arith.select %43, %44, %45 : vector<8x128xi1>, vector<8x128xf32>
    %cst_11 = arith.constant 0.000000e+00 : f32
    %47 = vector.broadcast %cst_11 : f32 to vector<8x1xf32>
    %cst_12 = arith.constant -1.000000e+30 : f32
    %c0_i32 = arith.constant 0 : i32
    %cst_13 = arith.constant dense<0xFF800000> : vector<8xf32>
    %48 = vector.multi_reduction <maximumf>, %46, %cst_13 [1] : vector<8x128xf32> to vector<8xf32>
    %49 = vector.shape_cast %48 : vector<8xf32> to vector<8x1xf32>
    %50 = vector.broadcast %49 : vector<8x1xf32> to vector<8x128xf32>
    %51 = arith.cmpf oge, %46, %50 : vector<8x128xf32>
    %52 = vector.broadcast %cst_12 : f32 to vector<8x128xf32>
    %53 = arith.select %51, %52, %46 : vector<8x128xi1>, vector<8x128xf32>
    %c1_i32 = arith.constant 1 : i32
    %cst_14 = arith.constant dense<0xFF800000> : vector<8xf32>
    %54 = vector.multi_reduction <maximumf>, %53, %cst_14 [1] : vector<8x128xf32> to vector<8xf32>
    %55 = vector.shape_cast %54 : vector<8xf32> to vector<8x1xf32>
    %56 = vector.broadcast %55 : vector<8x1xf32> to vector<8x128xf32>
    %57 = arith.cmpf oge, %53, %56 : vector<8x128xf32>
    %58 = vector.broadcast %cst_12 : f32 to vector<8x128xf32>
    %59 = arith.select %57, %58, %53 : vector<8x128xi1>, vector<8x128xf32>
    %c2_i32 = arith.constant 2 : i32
    %cst_15 = arith.constant dense<0xFF800000> : vector<8xf32>
    %60 = vector.multi_reduction <maximumf>, %59, %cst_15 [1] : vector<8x128xf32> to vector<8xf32>
    %61 = vector.shape_cast %60 : vector<8xf32> to vector<8x1xf32>
    %62 = vector.broadcast %61 : vector<8x1xf32> to vector<8x128xf32>
    %63 = arith.cmpf oge, %59, %62 : vector<8x128xf32>
    %64 = vector.broadcast %cst_12 : f32 to vector<8x128xf32>
    %65 = arith.select %63, %64, %59 : vector<8x128xi1>, vector<8x128xf32>
    %66 = vector.broadcast %61 : vector<8x1xf32> to vector<8x128xf32>
    %67 = arith.cmpf oge, %46, %66 : vector<8x128xf32>
    %cst_16 = arith.constant 0.000000e+00 : f32
    %68 = vector.broadcast %cst_16 : f32 to vector<8x128xf32>
    %69 = arith.select %67, %11, %68 : vector<8x128xi1>, vector<8x128xf32>
    %c0_17 = arith.constant 0 : index
    %c0_18 = arith.constant 0 : index
    %70 = vector.load %arg4[%c0_17, %c0_18] : memref<8x128xf32, #tpu.memory_space<vmem>>, vector<8x128xf32>
    tpu.vector_store %arg4[%c0_17, %c0_18], %69 {strides = array<i32>} : memref<8x128xf32, #tpu.memory_space<vmem>>, vector<8x128xf32>,
    return
  }
  func.func @transform_0(%arg0: i32) -> i32 {
    %c0_i32 = arith.constant 0 : i32
    %c0_i32_0 = arith.constant 0 : i32
    return %c0_i32 : i32
  }
  func.func @transform_1(%arg0: i32) -> (i32, i32) {
    %c0_i32 = arith.constant 0 : i32
    %c0_i32_0 = arith.constant 0 : i32
    return %arg0, %c0_i32 : i32, i32
  }
  func.func @transform_2(%arg0: i32) -> (i32, i32) {
    %c0_i32 = arith.constant 0 : i32
    %c0_i32_0 = arith.constant 0 : i32
    %c0_i32_1 = arith.constant 0 : i32
    return %c0_i32, %c0_i32_0 : i32, i32
  }
  func.func @transform_3(%arg0: i32) -> (i32, i32) {
    %c0_i32 = arith.constant 0 : i32
    %c0_i32_0 = arith.constant 0 : i32
    return %arg0, %c0_i32 : i32, i32
  }
}

</mosaic_0001>

<bundles_post_ra>
// kernel: tpu_custom_call.1
= control target key start
LH: loop header
LB: loop body
LE: loop exit
PB: predicated region body
PF: predicated region fallthrough
CT: control target
= control target key end

     0   :  { %vm74_vm0 = vcmask 523264   ;;  %s308_s0 = inlined_call_operand.<no memory space> [shape: s32[1], index: 0, kind: input, shape index: {}]   ;;  %s309_s1 = inlined_call_operand.vmem [shape: bf16[8,64], index: 1, kind: input, shape index: {}]   ;;  %s310_s2 = inlined_call_operand.vmem [shape: bf16[128,64], index: 2, kind: input, shape index: {}]   ;;  %s311_s3 = inlined_call_operand.hbm [shape: f32[8,128], index: 3, kind: output, shape index: {}]  }
   0x1   :  { %v215_v0 = vld [vmem:[%s310_s2 + $0x38] sm:$0xff] }
   0x2   :  { %9 = vsyncpa [#allocation4], 0  ;;  %v100_v1 = vsel %vm74_vm0, %v215_v0, 0  ;;  %v214_v2 = vld [vmem:[%s310_s2 + $0x30] sm:$0xff]  ;;  %v213_v4 = vld [vmem:[%s310_s2 + $0x28] sm:$0xff]  ;;  %v120_v17 = vlaneseq  ;;  %v130_v23 = vstv %s308_s0  ;;  %s245_s0 = smov [#allocation3]  }
   0x3   :  { %102 = vmatpush.bf16.xpose.msra.mxu0 %v100_v1  ;;  %v97_v3 = vsel %vm74_vm0, %v214_v2, 0  ;;  %v94_v5 = vsel %vm74_vm0, %v213_v4, 0  ;;  %v212_v6 = vld [vmem:[%s310_s2 + $0x20] sm:$0xff]  ;;  %v211_v8 = vld [vmem:[%s310_s2 + $0x18] sm:$0xff]  ;;  %v210_v10 = vld [vmem:[%s310_s2 + $0x10] sm:$0xff]  ;;  %s166_s6 = sshll.u32 %s311_s3, 4  ;;  %s167_s6 = int_to_ptr.hbm [resolvable:$true] %s166_s6 }
   0x4   :  { %v91_v7 = vsel %vm74_vm0, %v212_v6, 0  ;;  %v88_v9 = vsel %vm74_vm0, %v211_v8, 0  ;;  %v85_v11 = vsel %vm74_vm0, %v210_v10, 0  ;;  %v209_v12 = vld [vmem:[%s310_s2 + $0x8] sm:$0xff]  ;;  %v208_v14 = vld [vmem:[%s310_s2] sm:$0xff]  ;;  %v121_v18 = vshrl.u32 %v120_v17, 7 }
   0x5   :  { %v82_v13 = vsel %vm74_vm0, %v209_v12, 0  ;;  %v79_v15 = vsel %vm74_vm0, %v208_v14, 0  ;;  %v17_v16 = vld [vmem:[%s309_s1] sm:$0xf]  ;;  %v125_v19 = vand.u32 127, %v120_v17  ;;  %s164_s1 = sshll.u32 %s245_s0, 4  ;;  %s165_s1 = int_to_ptr.vmem [resolvable:$true] %s164_s1 }
   0x6   :  { %v127_v20 = vmul.u32 2654435761, %v121_v18 }
   0x7   :  { %v128_v21 = vmul.u32 2246822519, %v125_v19  ;;  %vm143_vm2 = vcmp.lt.s32.totalorder %v125_v19, 8 }
   0x9   :  { %v129_v22 = vadd.s32 %v128_v21, %v127_v20 }
   0xb   :  { %103 = vmatpush.bf16.xpose.msra.mxu0 %v97_v3  ;;  %v131_v24 = vadd.s32 %v130_v23, %v129_v22 }
   0xd   :  { %v132_v25 = vshrl.u32 %v131_v24, 16 }
   0xf   :  { %v133_v26 = vxor.u32 %v132_v25, %v131_v24 }
  0x11   :  { %v134_v27 = vmul.u32 2146121005, %v133_v26 }
  0x13   :  { %104 = vmatpush.bf16.xpose.msra.mxu0 %v94_v5  ;;  %v135_v28 = vshrl.u32 %v134_v27, 15 }
  0x15   :  { %v136_v29 = vxor.u32 %v135_v28, %v134_v27 }
  0x17   :  { %v137_v30 = vmul.u32 2221713035, %v136_v29 }
  0x19   :  { %v138_v31 = vshrl.u32 %v137_v30, 16 }
  0x1b   :  { %105 = vmatpush.bf16.xpose.msra.mxu0 %v91_v7  ;;  %v139_v32 = vxor.u32 %v138_v31, %v137_v30 }
  0x1d   :  { %v140_v35 = vand.u32 8388607, %v139_v32 }
  0x1f   :  { %v141_v36 = vcvt.s32.f32 %v140_v35 }
  0x21   :  { %v142_v39 = vmul.f32 1.1920929e-09, %v141_v36 }
  0x23   :  { %106 = vmatpush.bf16.xpose.msra.mxu0 %v88_v9 }
  0x2b   :  { %107 = vmatpush.bf16.xpose.msra.mxu0 %v85_v11 }
  0x33   :  { %108 = vmatpush.bf16.xpose.msra.mxu0 %v82_v13 }
  0x3b   :  { %109 = vmatpush.bf16.xpose.msra.mxu0 %v79_v15 }
  0x42   :  { %207 = vmatmul.msk.bf16.vlgmr.msra.gmra.mxu0 %vm74_vm0, %v17_v16 }
  0xbf   :  { %v111_v33 = vpop.f32.mrf.mxu0 }
  0xc0   :  { %v115_v34 = vmul.f32 3.0, %v111_v33 }
  0xc2   :  { %217 = vtanh.f32 %v115_v34 }
  0xc7   :  { %v113_v37 = vpop.f32.mrf.mxu0 }
  0xc8   :  { %v218_v38 = vpop.eup %217 }
  0xc9   :  { %vm117_vm1 = vcmp.gt.f32.partialorder %v218_v38, 0.0  ;;  %v118_v40 = vmul.f32 0.01, %v218_v38 }
  0xcb   :  { %v119_v41 = vsel %vm117_vm1, %v218_v38, %v118_v40 }
  0xcc   :  { %v144_v42 = vadd.f32 %v142_v39, %v119_v41 }
  0xce   :  { %v145_v43 = vsel %vm143_vm2, %v144_v42, -1e+30 }
  0xcf   :  { %146 = vmax.xlane.f32.xlu0 %v145_v43 }
 0x142   :  { %v147_v44 = vpop.xlane.xlu0 %146 }
 0x143   :  { %vm148_vm3 = vcmp.ge.f32.partialorder %v145_v43, %v147_v44 }
 0x144   :  { %v149_v45 = vsel %vm148_vm3, -1e+30, %v145_v43 }
 0x145   :  { %150 = vmax.xlane.f32.xlu0 %v149_v45 }
 0x1b8   :  { %v151_v46 = vpop.xlane.xlu0 %150 }
 0x1b9   :  { %vm152_vm4 = vcmp.ge.f32.partialorder %v149_v45, %v151_v46 }
 0x1ba   :  { %v153_v47 = vsel %vm152_vm4, -1e+30, %v149_v45 }
 0x1bb   :  { %154 = vmax.xlane.f32.xlu1 %v153_v47 }
 0x22e   :  { %v155_v48 = vpop.xlane.xlu1 %154 }
 0x22f   :  { %vm156_vm5 = vcmp.ge.f32.partialorder %v145_v43, %v155_v48 }
 0x230   :  { %v157_v49 = vsel %vm156_vm5, %v119_v41, 0.0 }
 0x231   :  { %158 = vst [vmem:[#allocation3] sm:$0xff] %v157_v49 }
 0x232   :  { %169 = dma.vmem_to_hbm [thread:$0]  %s165_s1, 128, %s167_s6, [#allocation4]  }
 0x233   :  { %243 = dma.done.wait [#allocation4], 128  }
 0x234   :  { %244 = vsyncadd [#allocation4], 4294967168 }
 0x235   :  { %174 = vsyncpa [#allocation4], 1 }

</bundles_post_ra>
